<compile_context>
chip_gen: v5e
topology: v5e:2x2
jax: 0.10.0
libtpu: 0.0.40
codegen_flags: <defaults>
</compile_context>

<pallas_src>
import jax
import jax.numpy as jnp
from jax.experimental import pallas as pl
from jax.experimental.pallas import tpu as pltpu

LANE = 128            # TPU lane width
SUBLANE = 8           # f32 sublane height
MAX_BATCH_TILE = 2048


def _round_up(x, m):
    return (x + m - 1) // m * m


def _pick_batch_tile(batch):
    """Largest tile (<= MAX_BATCH_TILE, multiple of 8) minimizing batch padding."""
    b8 = _round_up(batch, SUBLANE)
    if b8 <= MAX_BATCH_TILE:
        return b8
    candidates = (2048, 1536, 1024, 768, 512, 384, 256, 128, 64, 32, 16, 8)
    # Minimize padded rows; break ties toward the larger tile (fewer grid steps).
    return min(candidates, key=lambda t: (_round_up(batch, t) - batch, -t))


def _vmem_limit_bytes():
    """Generation-specific scoped-VMEM budget."""
    try:
        kind = jax.devices()[0].device_kind.lower()
    except Exception:
        kind = ""
    if "v7" in kind or "7x" in kind:
        return 48 * 1024 * 1024        # v7x: 64 MiB physical per TensorCore
    if "v5" in kind or "v6" in kind:
        return 100 * 1024 * 1024       # v5e / v6e: 128 MiB physical
    return 32 * 1024 * 1024            # unknown backend / interpret: default


def mlp_kernel(x_ref, w1_ref, b1_ref, w2_ref, b2_ref, o_ref):
    # In-kernel cast to bf16 (VPU filler, hides under the activation DMA).
    x = x_ref[...].astype(jnp.bfloat16)

    # ---- Linear 1 (bf16 operands -> MXU, f32 accumulation) ----
    h = jnp.dot(x, w1_ref[...], preferred_element_type=jnp.float32)
    # Bias + ReLU in f32 on the VPU (padded hidden columns stay exactly 0).
    h = jnp.maximum(h + b1_ref[...], 0.0)

    # ---- Linear 2 ----
    logits = jnp.dot(h.astype(jnp.bfloat16), w2_ref[...],
                     preferred_element_type=jnp.float32)
    # Padded output columns carry a -1e30 bias -> exp() underflows to exactly
    # 0, so the softmax normalizer only sees the real 10 logits.
    logits = logits + b2_ref[...]

    # ---- Softmax(dim=1), numerically stable, exact normalization ----
    m = jnp.max(logits, axis=1, keepdims=True)
    e = jnp.exp(logits - m)
    denom = jnp.sum(e, axis=1, keepdims=True)
    o_ref[...] = (e / denom).astype(o_ref.dtype)


def make_mlp(w1, b1, w2, b2):
    """Pads / casts the parameters once; returns a jitted forward(x)."""
    d_in, h_dim = w1.shape
    out_dim = w2.shape[1]
    h_pad = _round_up(h_dim, LANE)
    out_pad = _round_up(out_dim, LANE)

    # ---- pad weights to lane-dense shapes (hoisted out of the forward) ----
    w1p = jnp.zeros((d_in, h_pad), jnp.bfloat16).at[:, :h_dim].set(
        w1.astype(jnp.bfloat16))
    b1p = jnp.zeros((1, h_pad), jnp.float32).at[:, :h_dim].set(
        b1.reshape(1, -1).astype(jnp.float32))
    w2p = jnp.zeros((h_pad, out_pad), jnp.bfloat16).at[:h_dim, :out_dim].set(
        w2.astype(jnp.bfloat16))
    b2p = jnp.full((1, out_pad), -1e30, jnp.float32).at[:, :out_dim].set(
        b2.reshape(1, -1).astype(jnp.float32))

    vmem_limit = _vmem_limit_bytes()

    @jax.jit
    def forward(x):
        batch = x.shape[0]
        tb = _pick_batch_tile(batch)
        b_pad = _round_up(batch, tb)

        # Feed x in its native f32; pad rows only when actually needed.
        xp = x if b_pad == batch else (
            jnp.zeros((b_pad, d_in), x.dtype).at[:batch].set(x))

        grid = (b_pad // tb,)

        cost = pl.CostEstimate(
            flops=2 * b_pad * (d_in * h_pad + h_pad * out_pad),
            transcendentals=b_pad * out_pad,
            bytes_accessed=(xp.size * 4
                            + w1p.size * 2 + w2p.size * 2
                            + b1p.size * 4 + b2p.size * 4
                            + b_pad * out_pad * 2),
        )

        out = pl.pallas_call(
            mlp_kernel,
            # bf16 padded output -> halves the dominant HBM write traffic.
            out_shape=jax.ShapeDtypeStruct((b_pad, out_pad), jnp.bfloat16),
            grid_spec=pltpu.PrefetchScalarGridSpec(
                num_scalar_prefetch=0,
                grid=grid,
                in_specs=[
                    # activations: pipelined over the batch grid
                    pl.BlockSpec((tb, d_in), lambda i: (i, 0)),
                    # weights / biases: constant index_map -> VMEM-resident
                    pl.BlockSpec((d_in, h_pad), lambda i: (0, 0)),
                    pl.BlockSpec((1, h_pad), lambda i: (0, 0)),
                    pl.BlockSpec((h_pad, out_pad), lambda i: (0, 0)),
                    pl.BlockSpec((1, out_pad), lambda i: (0, 0)),
                ],
                out_specs=pl.BlockSpec((tb, out_pad), lambda i: (i, 0)),
            ),
            compiler_params=pltpu.CompilerParams(
                # TODO(synk): on v7x verify both TensorCores are busy; if not,
                # switch this axis to pltpu.CORE_PARALLEL.
                dimension_semantics=("parallel",),
                vmem_limit_bytes=vmem_limit,
            ),
            cost_estimate=cost,
        )(xp, w1p, b1p, w2p, b2p)

        # Mirror PyTorch `x.view(-1, 10)` + f32 output dtype.  Under jit this
        # slice/cast fuses with the epilogue instead of a separate HBM pass.
        return out[:batch, :out_dim].astype(jnp.float32)

    return forward


if __name__ == "__main__":
    key = jax.random.PRNGKey(0)
    kx, k1, k2, k3, k4 = jax.random.split(key, 5)

    B, D_IN, HIDDEN, D_OUT = 2, 64, 32, 10

    x = jax.random.normal(kx, (B, D_IN), dtype=jnp.float32)
    # Deterministic synthetic parameters (stored [in, out]).
    w1 = jax.random.normal(k1, (D_IN, HIDDEN), dtype=jnp.float32) * 0.1
    b1 = jax.random.normal(k2, (1, HIDDEN), dtype=jnp.float32) * 0.1
    w2 = jax.random.normal(k3, (HIDDEN, D_OUT), dtype=jnp.float32) * 0.1
    b2 = jax.random.normal(k4, (1, D_OUT), dtype=jnp.float32) * 0.1

    forward = make_mlp(w1, b1, w2, b2)
    y = jax.block_until_ready(forward(x))

    # Pure-JAX f32 reference (tolerances account for bf16 matmul operands and
    # the bf16 output store; normalization itself is exact).
    h_ref = jnp.maximum(x @ w1 + b1, 0.0)
    y_ref = jax.nn.softmax(h_ref @ w2 + b2, axis=1)

    assert y.shape == (B, D_OUT)
    # Row sums ~ 1 (exact division in-kernel; bf16 output rounding << 1e-2).
    assert jnp.allclose(jnp.sum(y, axis=1), 1.0, atol=1e-2)
    assert jnp.allclose(y, y_ref, atol=5e-2)

    print("KERNEL_OK")
</pallas_src>

<mosaic_0001>
module attributes {stable_mosaic.version = 11 : i64} {
  func.func @mlp_kernel(%arg0: i32, %arg1: memref<8x64xf32, #tpu.memory_space<vmem>>, %arg2: memref<64x128xbf16, #tpu.memory_space<vmem>>, %arg3: memref<1x128xf32, #tpu.memory_space<vmem>>, %arg4: memref<128x128xbf16, #tpu.memory_space<vmem>>, %arg5: memref<1x128xf32, #tpu.memory_space<vmem>>, %arg6: memref<8x128xbf16, #tpu.memory_space<vmem>>) attributes {dimension_semantics = [#tpu.dimension_semantics<parallel>], iteration_bounds = array<i64: 1>, scalar_prefetch = 0 : i64, scratch_operands = 0 : i64, tpu.core_type = #tpu.core_type<tc>, window_params = [{transform_indices = @transform_0, window_bounds = array<i64: 8, 64>}, {pipeline_mode = #tpu.pipeline_mode<synchronous>, transform_indices = @transform_1, window_bounds = array<i64: 64, 128>}, {pipeline_mode = #tpu.pipeline_mode<synchronous>, transform_indices = @transform_2, window_bounds = array<i64: 1, 128>}, {pipeline_mode = #tpu.pipeline_mode<synchronous>, transform_indices = @transform_3, window_bounds = array<i64: 128, 128>}, {pipeline_mode = #tpu.pipeline_mode<synchronous>, transform_indices = @transform_4, window_bounds = array<i64: 1, 128>}, {transform_indices = @transform_5, window_bounds = array<i64: 8, 128>}]} {
    %c0 = arith.constant 0 : index
    %c0_0 = arith.constant 0 : index
    %0 = vector.load %arg1[%c0, %c0_0] : memref<8x64xf32, #tpu.memory_space<vmem>>, vector<8x64xf32>
    %1 = arith.truncf %0 : vector<8x64xf32> to vector<8x64xbf16>
    %c0_1 = arith.constant 0 : index
    %c0_2 = arith.constant 0 : index
    %2 = vector.load %arg2[%c0_1, %c0_2] : memref<64x128xbf16, #tpu.memory_space<vmem>>, vector<64x128xbf16>
    %cst = arith.constant dense<0.000000e+00> : vector<8x128xf32>
    %3 = tpu.matmul %1, %2, %cst {dimension_numbers = #tpu.dot_dimension_numbers<[1], [0], [0], [1], [0, 0, 1, 1], [], []>} : vector<8x64xbf16>, vector<64x128xbf16>, vector<8x128xf32> -> vector<8x128xf32>
    %c0_3 = arith.constant 0 : index
    %c0_4 = arith.constant 0 : index
    %4 = vector.load %arg3[%c0_3, %c0_4] : memref<1x128xf32, #tpu.memory_space<vmem>>, vector<1x128xf32>
    %5 = vector.broadcast %4 : vector<1x128xf32> to vector<8x128xf32>
    %6 = arith.addf %3, %5 : vector<8x128xf32>
    %cst_5 = arith.constant 0.000000e+00 : f32
    %7 = vector.broadcast %cst_5 : f32 to vector<8x128xf32>
    %8 = arith.maximumf %6, %7 : vector<8x128xf32>
    %9 = arith.truncf %8 : vector<8x128xf32> to vector<8x128xbf16>
    %c0_6 = arith.constant 0 : index
    %c0_7 = arith.constant 0 : index
    %10 = vector.load %arg4[%c0_6, %c0_7] : memref<128x128xbf16, #tpu.memory_space<vmem>>, vector<128x128xbf16>
    %cst_8 = arith.constant dense<0.000000e+00> : vector<8x128xf32>
    %11 = tpu.matmul %9, %10, %cst_8 {dimension_numbers = #tpu.dot_dimension_numbers<[1], [0], [0], [1], [0, 0, 1, 1], [], []>} : vector<8x128xbf16>, vector<128x128xbf16>, vector<8x128xf32> -> vector<8x128xf32>
    %c0_9 = arith.constant 0 : index
    %c0_10 = arith.constant 0 : index
    %12 = vector.load %arg5[%c0_9, %c0_10] : memref<1x128xf32, #tpu.memory_space<vmem>>, vector<1x128xf32>
    %13 = vector.broadcast %12 : vector<1x128xf32> to vector<8x128xf32>
    %14 = arith.addf %11, %13 : vector<8x128xf32>
    %cst_11 = arith.constant dense<0xFF800000> : vector<8xf32>
    %15 = vector.multi_reduction <maximumf>, %14, %cst_11 [1] : vector<8x128xf32> to vector<8xf32>
    %16 = vector.shape_cast %15 : vector<8xf32> to vector<8x1xf32>
    %17 = vector.broadcast %16 : vector<8x1xf32> to vector<8x128xf32>
    %18 = arith.subf %14, %17 : vector<8x128xf32>
    %19 = math.exp %18 : vector<8x128xf32>
    %cst_12 = arith.constant dense<0.000000e+00> : vector<8xf32>
    %20 = vector.multi_reduction <add>, %19, %cst_12 [1] : vector<8x128xf32> to vector<8xf32>
    %21 = vector.shape_cast %20 : vector<8xf32> to vector<8x1xf32>
    %22 = vector.broadcast %21 : vector<8x1xf32> to vector<8x128xf32>
    %23 = arith.divf %19, %22 : vector<8x128xf32>
    %24 = arith.truncf %23 : vector<8x128xf32> to vector<8x128xbf16>
    %c0_13 = arith.constant 0 : index
    %c0_14 = arith.constant 0 : index
    %25 = vector.load %arg6[%c0_13, %c0_14] : memref<8x128xbf16, #tpu.memory_space<vmem>>, vector<8x128xbf16>
    tpu.vector_store %arg6[%c0_13, %c0_14], %24 {strides = array<i32>} : memref<8x128xbf16, #tpu.memory_space<vmem>>, vector<8x128xbf16>,
    return
  }
  func.func @transform_0(%arg0: i32) -> (i32, i32) {
    %c0_i32 = arith.constant 0 : i32
    %c0_i32_0 = arith.constant 0 : i32
    return %arg0, %c0_i32 : i32, i32
  }
  func.func @transform_1(%arg0: i32) -> (i32, i32) {
    %c0_i32 = arith.constant 0 : i32
    %c0_i32_0 = arith.constant 0 : i32
    %c0_i32_1 = arith.constant 0 : i32
    return %c0_i32, %c0_i32_0 : i32, i32
  }
  func.func @transform_2(%arg0: i32) -> (i32, i32) {
    %c0_i32 = arith.constant 0 : i32
    %c0_i32_0 = arith.constant 0 : i32
    %c0_i32_1 = arith.constant 0 : i32
    return %c0_i32, %c0_i32_0 : i32, i32
  }
  func.func @transform_3(%arg0: i32) -> (i32, i32) {
    %c0_i32 = arith.constant 0 : i32
    %c0_i32_0 = arith.constant 0 : i32
    %c0_i32_1 = arith.constant 0 : i32
    return %c0_i32, %c0_i32_0 : i32, i32
  }
  func.func @transform_4(%arg0: i32) -> (i32, i32) {
    %c0_i32 = arith.constant 0 : i32
    %c0_i32_0 = arith.constant 0 : i32
    %c0_i32_1 = arith.constant 0 : i32
    return %c0_i32, %c0_i32_0 : i32, i32
  }
  func.func @transform_5(%arg0: i32) -> (i32, i32) {
    %c0_i32 = arith.constant 0 : i32
    %c0_i32_0 = arith.constant 0 : i32
    return %arg0, %c0_i32 : i32, i32
  }
}

</mosaic_0001>

<bundles_post_ra>
// kernel: forward.1
= control target key start
LH: loop header
LB: loop body
LE: loop exit
PB: predicated region body
PF: predicated region fallthrough
CT: control target
= control target key end

     0   :  { %10 = vsyncpa [#allocation3], 0  ;;  %s396_s0 = inlined_call_operand.vmem [shape: f32[8,64], index: 0, kind: input, shape index: {}]   ;;  %s397_s1 = inlined_call_operand.hbm [shape: bf16[64,128], index: 1, kind: input, shape index: {}]   ;;  %s398_s2 = inlined_call_operand.vmem [shape: f32[1,128], index: 2, kind: input, shape index: {}]   ;;  %s399_s3 = inlined_call_operand.hbm [shape: bf16[128,128], index: 3, kind: input, shape index: {}]   ;;  %s400_s4 = inlined_call_operand.vmem [shape: f32[1,128], index: 4, kind: input, shape index: {}]   ;;  %s401_s5 = inlined_call_operand.vmem [shape: bf16[8,128], index: 5, kind: output, shape index: {}]  }
   0x1   :  { %s18_s20 = sshll.u32 %s397_s1, 4  ;;  %s19_s20 = int_to_ptr.hbm [resolvable:$true] %s18_s20 }
   0x2   :  { %11 = vsyncpa [#allocation5], 0  ;;  %s344_s21 = smov [#allocation2]   ;;  %s33_s25 = sshll.u32 %s399_s3, 4  ;;  %s34_s25 = int_to_ptr.hbm [resolvable:$true] %s33_s25 }
   0x3   :  { %s20_s22 = sshll.u32 %s344_s21, 4  ;;  %s345_s26 = smov 64   ;;  %s21_s22 = int_to_ptr.vmem [resolvable:$true] %s20_s22 }
   0x4   :  { %s346_s27 = smov 4   ;;  %s347_s28 = smov [#allocation4]  }
   0x5   :  { %26 = dma.hbm_to_vmem [thread:$0]  %s19_s20, 512, %s21_s22, [#allocation3], %s345_s26, %s345_s26, %s346_s27  }
   0x6   :  { %s35_s29 = sshll.u32 %s347_s28, 4  ;;  %s36_s29 = int_to_ptr.vmem [resolvable:$true] %s35_s29 }
   0x7   :  { %41 = dma.hbm_to_vmem [thread:$0]  %s34_s25, 1024, %s36_s29, [#allocation5], %s345_s26, %s345_s26, %s346_s27  }
   0x8   :  { %340 = dma.done.wait [#allocation3], 512  }
   0x9   :  { %341 = vsyncadd [#allocation3], 4294966784 }
   0xa   :  { %342 = dma.done.wait [#allocation5], 1024  }
   0xb   :  { %343 = vsyncadd [#allocation5], 4294966272  ;;  %v273_v0 = vld [vmem:[#allocation2 + $0x18] sm:$0xff]  ;;  %v272_v2 = vld [vmem:[#allocation2 + $0x10] sm:$0xff]  ;;  %vm91_vm0 = vcmask 523264  }
   0xc   :  { %v281_v1 = vld [vmem:[#allocation4 + $0x38] sm:$0xff]  ;;  %99 = vmatpush.bf16.msra.mxu0 %v273_v0  ;;  %v280_v3 = vld [vmem:[#allocation4 + $0x30] sm:$0xff]  ;;  %v271_v4 = vld [vmem:[#allocation2 + $0x8] sm:$0xff] }
   0xd   :  { %178 = vmatpush.bf16.msra.mxu1 %v281_v1  ;;  %v279_v5 = vld [vmem:[#allocation4 + $0x28] sm:$0xff]  ;;  %v270_v6 = vld [vmem:[#allocation2] sm:$0xff]  ;;  %v277_v10 = vld [vmem:[#allocation4 + $0x18] sm:$0xff] }
   0xe   :  { %v53_v7 = vld [vmem:[%s396_s0] sm:$0xff]  ;;  %v276_v11 = vld [vmem:[#allocation4 + $0x10] sm:$0xff]  ;;  %v275_v12 = vld [vmem:[#allocation4 + $0x8] sm:$0xff] }
   0xf   :  { %v278_v8 = vld [vmem:[#allocation4 + $0x20] sm:$0xff]  ;;  %v54_v9 = vpack.c.bf16 %v53_v7, %v53_v7 }
  0x10   :  { %100 = vmatpush.bf16.msra.mxu0 %v272_v2  ;;  %v274_v13 = vld [vmem:[#allocation4] sm:$0xff] }
  0x11   :  { %179 = vmatpush.bf16.msra.mxu1 %v280_v3  ;;  %v286_v14 = vld [vmem:[%s398_s2] ss:$0 sm:$0xff] }
  0x12   :  { %v287_v20 = vld [vmem:[%s400_s4] ss:$0 sm:$0xff] }
  0x14   :  { %101 = vmatpush.bf16.msra.mxu0 %v271_v4 }
  0x15   :  { %180 = vmatpush.bf16.msra.mxu1 %v279_v5 }
  0x18   :  { %102 = vmatpush.bf16.msra.mxu0 %v270_v6 }
  0x19   :  { %181 = vmatpush.bf16.msra.mxu1 %v278_v8 }
  0x1b   :  { %237 = vmatmul.msk.bf16.vlgmr.msra.gmra.mxu0 %vm91_vm0, %v54_v9 }
  0x1d   :  { %182 = vmatpush.bf16.msra.mxu1 %v277_v10 }
  0x21   :  { %183 = vmatpush.bf16.msra.mxu1 %v276_v11 }
  0x25   :  { %184 = vmatpush.bf16.msra.mxu1 %v275_v12 }
  0x29   :  { %185 = vmatpush.bf16.msra.mxu1 %v274_v13 }
  0x98   :  { %v104_v15 = vpop.f32.mrf.mxu0 }
  0x99   :  { %v105_v16 = vadd.f32 %v286_v14, %v104_v15 }
  0x9b   :  { %v108_v17 = vmax.f32 %v105_v16, 0.0 }
  0x9d   :  { %v109_v18 = vpack.c.bf16 %v108_v17, %v108_v17 }
  0x9f   :  { %186 = vmatmul.bf16.vlgmr.msra.gmra.mxu1 %v109_v18 }
  0xa0   :  { %v106_v19 = vpop.f32.mrf.mxu0 }
 0x11c   :  { %v187_v21 = vpop.f32.mrf.mxu1 }
 0x11d   :  { %v188_v22 = vadd.f32 %v287_v20, %v187_v21 }
 0x11f   :  { %191 = vmax.xlane.f32.xlu0 %v188_v22 }
 0x124   :  { %v189_v23 = vpop.f32.mrf.mxu1 }
 0x192   :  { %v192_v24 = vpop.xlane.xlu0 %191 }
 0x193   :  { %v193_v25 = vsub.f32 %v188_v22, %v192_v24 }
 0x195   :  { %v194_v26 = vmul.f32 1.442695, %v193_v25 }
 0x197   :  { %288 = vpow2.f32 %v194_v26 }
 0x19d   :  { %v289_v27 = vpop.eup %288 }
 0x19e   :  { %196 = vadd.xlane.f32.xlu0 %v289_v27 }
 0x211   :  { %v197_v28 = vpop.xlane.xlu0 %196 }
 0x212   :  { %290 = vrcp.f32 %v197_v28  ;;  %v209_v32 = vand.u32 2147483648, %v197_v28  ;;  %v207_v34 = vand.u32 2147483647, %v197_v28  ;;  %vm203_vm2 = vweird.f32 %v197_v28 }
 0x214   :  { %v210_v36 = vor.u32 1.1754944e-38, %v209_v32  ;;  %vm208_vm4 = vcmp.eq.f32.partialorder %v207_v34, 8.507059e+37 }
 0x218   :  { %v291_v29 = vpop.eup %290 }
 0x219   :  { %v199_v30 = vmul.f32 %v291_v29, %v197_v28  ;;  %vm204_vm1 = vweird.f32 %v291_v29 }
 0x21a   :  { %vm205_vm3 = vmor %vm203_vm2, %vm204_vm1 }
 0x21b   :  { %v200_v31 = vsub.f32 1.0, %v199_v30 }
 0x21d   :  { %v201_v33 = vmul.f32 %v291_v29, %v200_v31 }
 0x21f   :  { %v202_v35 = vadd.f32 %v291_v29, %v201_v33 }
 0x221   :  { %v206_v37 = vsel %vm205_vm3, %v291_v29, %v202_v35 }
 0x222   :  { %v211_v38 = vsel %vm208_vm4, %v210_v36, %v206_v37 }
 0x223   :  { %v212_v39 = vmul.f32 %v289_v27, %v211_v38 }
 0x225   :  { %v213_v40 = vpack.c.bf16 %v212_v39, %v212_v39 }
 0x227   :  { %214 = vst [vmem:[%s401_s5] sm:$0xf] %v213_v40 }
 0x228   :  { %219 = vsyncpa [#allocation3], 1 }
 0x229   :  { %220 = vsyncpa [#allocation5], 1 }

</bundles_post_ra>
